<compile_context>
chip_gen: v6e
topology: v6e:2x2x1
jax: 0.10.0
libtpu: 0.0.40
codegen_flags: <defaults>
</compile_context>

<pallas_src>
import jax
import jax.numpy as jnp
from jax.experimental import pallas as pl
from jax.experimental.pallas import tpu as pltpu


def _grouped_conv3_double_sigmoid(s_f32, mx, w, o_ref):
    """Grouped conv1d (k=3, zero padding=1, no bias) + double sigmoid.

    s_f32: (TB, G, L) f32 per-group channel sum.
    mx   : (TB, G, L) per-group channel max (input dtype; max is exact in any dtype).
    w    : (2, 3, G, 1) f32 conv weight, w[ic, k, g, 0] = weight[g, ic, k];
           the avg branch (ic=0) is pre-scaled by 1/group_width in the wrapper.
    """
    G, L = o_ref.shape[-2], o_ref.shape[-1]
    m_f32 = mx.astype(jnp.float32)

    lane = jax.lax.broadcasted_iota(jnp.int32, (G, L), 1)
    not_first = lane != 0          # conv zero-padding at t = 0 for the "prev" tap
    not_last = lane != (L - 1)     # conv zero-padding at t = L-1 for the "next" tap

    # 4 independent XLU rolls (no concatenated copy). shift=L-1 is a shift by -1.
    s_prev = jnp.where(not_first, pltpu.roll(s_f32, shift=1, axis=2), 0.0)
    s_next = jnp.where(not_last, pltpu.roll(s_f32, shift=L - 1, axis=2), 0.0)
    m_prev = jnp.where(not_first, pltpu.roll(m_f32, shift=1, axis=2), 0.0)
    m_next = jnp.where(not_last, pltpu.roll(m_f32, shift=L - 1, axis=2), 0.0)

    conv = (w[0, 0] * s_prev + w[0, 1] * s_f32 + w[0, 2] * s_next
            + w[1, 0] * m_prev + w[1, 1] * m_f32 + w[1, 2] * m_next)

    # The module applies sigmoid twice (before and after the group broadcast); the
    # broadcast is pure replication, so the compact map carries full semantics.
    att = jax.nn.sigmoid(jax.nn.sigmoid(conv))
    o_ref[...] = att.astype(o_ref.dtype)


def _spatial_attention_kernel_dense(x_ref, w_ref, o_ref):
    """Dense-channel path (used when group_width % 8 != 0).

    x_ref: (TB, C, L) with C = G * gw, channels in group-major order.
    w_ref: (2, 3, G, 1) conv weight (avg branch pre-scaled by 1/gw).
    o_ref: (TB, G, L) compact attention map.
    """
    TB, G, L = o_ref.shape
    C = x_ref.shape[1]
    gw = C // G
    # Channel offset r of every group lives at rows r, r+gw, ..., r+(G-1)*gw:
    # a sublane-strided load straight into the (TB, G, L) stats layout.
    first = x_ref[:, pl.ds(0, G, stride=gw), :]
    s = first.astype(jnp.float32)          # f32 sum accumulation
    m = first                              # max stays in input dtype (exact)
    for r in range(1, gw):
        xr = x_ref[:, pl.ds(r, G, stride=gw), :]
        s = s + xr.astype(jnp.float32)
        m = jnp.maximum(m, xr)
    _grouped_conv3_double_sigmoid(s, m, w_ref[...], o_ref)


def _spatial_attention_kernel_grouped(x_ref, w_ref, o_ref):
    """Grouped-layout path (used when group_width % 8 == 0, so no sublane padding).

    x_ref: (TB, G, gw, L); w_ref: (2, 3, G, 1); o_ref: (TB, G, L).
    """
    x = x_ref[...]                                        # input dtype, no f32 copy
    s = jnp.sum(x, axis=2, dtype=jnp.float32)             # f32 accumulation
    m = jnp.max(x, axis=2)                                # exact in input dtype
    _grouped_conv3_double_sigmoid(s, m, w_ref[...], o_ref)


def _pick_batch_tile(B, per_b_bytes, budget_bytes=8 * 1024 * 1024, min_steps=4):
    """Largest divisor of B whose estimated VMEM use (double-buffered blocks + in-body
    temporaries) fits the budget, while keeping enough grid steps for DMA/compute
    pipelining and (when possible) an even step count for v7x's two TensorCores."""
    divisors = [d for d in range(B, 0, -1) if B % d == 0]
    want_steps = min(min_steps, B)

    def pick(require_even_steps):
        for d in divisors:
            steps = B // d
            if d > 1 and d * per_b_bytes > budget_bytes:
                continue
            if steps < want_steps:
                continue
            if require_even_steps and (steps % 2) and steps != B:
                continue
            return d
        return None

    return pick(True) or pick(False) or 1


def spatial_attention_map_pallas(x, weight, groups):
    """Compact attention map.

    x: (B, C, L); weight: (groups, 2, 3) grouped Conv1d weight (no bias).
    Returns (B, groups, L): the doubly-sigmoided per-group attention row.
    """
    B, C, L = x.shape
    G = int(groups)
    assert C % G == 0, "channels must be divisible by groups"
    gw = C // G

    # Fold the 1/group_width mean factor into the avg-branch weights; the kernel then
    # only needs the raw channel sum.  weight[g, ic, k] -> w_t[ic, k, g, 0].
    w32 = weight.astype(jnp.float32) * jnp.array([1.0 / gw, 1.0], jnp.float32)[None, :, None]
    w_t = jnp.transpose(w32, (1, 2, 0))[..., None]         # (2, 3, G, 1)

    pad8 = lambda n: -(-n // 8) * 8
    pad128 = lambda n: -(-n // 128) * 128
    itemsize = x.dtype.itemsize
    dense = (gw % 8 != 0)
    if dense:
        in_b = pad8(C) * pad128(L) * itemsize              # dense (C, L) slab per batch
    else:
        in_b = G * pad8(gw) * pad128(L) * itemsize         # (gw, L) slabs, no padding
    out_b = pad8(G) * pad128(L) * itemsize
    # ~10 live (TB, G, L) f32 temporaries in the body (sum, max, 4 rolls, conv, att, ...).
    tmp_b = 10 * pad8(G) * pad128(L) * 4
    per_b = 2 * in_b + 2 * out_b + tmp_b                   # double-buffered blocks + temps
    TB = _pick_batch_tile(B, per_b)

    if dense:
        kernel = _spatial_attention_kernel_dense
        x_in = x
        x_spec = pl.BlockSpec((TB, C, L), lambda b: (b, 0, 0))
    else:
        kernel = _spatial_attention_kernel_grouped
        x_in = x.reshape(B, G, gw, L)                      # free metadata reshape
        x_spec = pl.BlockSpec((TB, G, gw, L), lambda b: (b, 0, 0, 0))

    return pl.pallas_call(
        kernel,
        out_shape=jax.ShapeDtypeStruct((B, G, L), x.dtype),
        grid=(B // TB,),
        in_specs=[
            x_spec,
            pl.BlockSpec((2, 3, G, 1), lambda b: (0, 0, 0, 0)),
        ],
        out_specs=pl.BlockSpec((TB, G, L), lambda b: (b, 0, 0)),
        compiler_params=pltpu.CompilerParams(
            dimension_semantics=("parallel",),
            # Raises v5e's 16 MiB scoped default; matches the v6e/v7x default and
            # leaves ample headroom over the <=8 MiB block/temporary budget.
            vmem_limit_bytes=32 * 1024 * 1024,
        ),
    )(x_in, w_t)


def spatial_attention_pallas(x, weight, groups):
    """Module-equivalent forward: (B, C, L) attention, broadcast over group_width.

    The broadcast is pure replication (no compute); a real consumer would fuse
    `x * att` against the compact (B, G, L) map instead of materializing this tensor.
    """
    B, C, L = x.shape
    gw = C // groups
    att = spatial_attention_map_pallas(x, weight, groups)  # (B, G, L)
    return jnp.broadcast_to(att[:, :, None, :], (B, groups, gw, L)).reshape(B, C, L)


def spatial_attention_reference(x, weight, groups):
    """Pure-JAX reference mirroring the PyTorch forward (for validation)."""
    B, C, L = x.shape
    gw = C // groups
    xg = x.reshape(B, groups, gw, L)
    avg = xg.mean(axis=2)                                  # (B, G, L)
    mx = xg.max(axis=2)                                    # (B, G, L)
    stats = jnp.stack([avg, mx], axis=2).reshape(B, 2 * groups, L)
    pad = jnp.pad(stats, ((0, 0), (0, 0), (1, 1)))
    out = jnp.zeros((B, groups, L), jnp.float32)
    for g in range(groups):
        for ic in range(2):
            for k in range(3):
                out = out.at[:, g, :].add(weight[g, ic, k] * pad[:, 2 * g + ic, k:k + L])
    s = jax.nn.sigmoid(out)
    s = jnp.repeat(s, gw, axis=1)                          # (B, G*gw, L)
    return jax.nn.sigmoid(s)


def _run_case(key, B, groups, group_width, L):
    C = groups * group_width
    kx, kw = jax.random.split(key)
    x = jax.random.normal(kx, (B, C, L), dtype=jnp.float32)
    # kaiming_normal_ for Conv1d(2*groups, groups, k=3, groups=groups, bias=False):
    # weight shape (groups, 2, 3), fan_in = 2*3, std = sqrt(2 / fan_in).
    std = (2.0 / (2 * 3)) ** 0.5
    weight = std * jax.random.normal(kw, (groups, 2, 3), dtype=jnp.float32)

    out = spatial_attention_pallas(x, weight, groups)
    out = jax.block_until_ready(out)
    ref = spatial_attention_reference(x, weight, groups)
    assert out.shape == (B, C, L)
    assert jnp.allclose(out, ref, atol=1e-5, rtol=1e-5), "Pallas kernel mismatch vs reference"


if __name__ == "__main__":
    key = jax.random.PRNGKey(0)
    k1, k2 = jax.random.split(key)
    # group_width=4 -> dense sublane-strided pooling path
    _run_case(k1, B=2, groups=4, group_width=4, L=16)
    # group_width=8 -> padding-free grouped (B, G, gw, L) vectorized-reduce path
    _run_case(k2, B=2, groups=2, group_width=8, L=16)
    print("KERNEL_OK")
</pallas_src>

<mosaic_0001>
module attributes {stable_mosaic.version = 11 : i64} {
  func.func @_spatial_attention_kernel_dense(%arg0: i32, %arg1: memref<1x16x16xf32, #tpu.memory_space<vmem>>, %arg2: memref<2x3x4x1xf32, #tpu.memory_space<vmem>>, %arg3: memref<1x4x16xf32, #tpu.memory_space<vmem>>) attributes {dimension_semantics = [#tpu.dimension_semantics<parallel>], iteration_bounds = array<i64: 2>, scalar_prefetch = 0 : i64, scratch_operands = 0 : i64, tpu.core_type = #tpu.core_type<tc>, window_params = [{transform_indices = @transform_0, window_bounds = array<i64: 1, 16, 16>}, {pipeline_mode = #tpu.pipeline_mode<synchronous>, transform_indices = @transform_1, window_bounds = array<i64: 2, 3, 4, 1>}, {transform_indices = @transform_2, window_bounds = array<i64: 1, 4, 16>}]} {
    %c0 = arith.constant 0 : index
    %c0_0 = arith.constant 0 : index
    %c0_1 = arith.constant 0 : index
    %0 = tpu.strided_load %arg1[%c0, %c0_0, %c0_1] {strides = array<i32: 1, 4, 1>} : memref<1x16x16xf32, #tpu.memory_space<vmem>>, vector<1x4x16xf32>
    %c0_2 = arith.constant 0 : index
    %c1 = arith.constant 1 : index
    %c0_3 = arith.constant 0 : index
    %1 = tpu.strided_load %arg1[%c0_2, %c1, %c0_3] {strides = array<i32: 1, 4, 1>} : memref<1x16x16xf32, #tpu.memory_space<vmem>>, vector<1x4x16xf32>
    %2 = arith.addf %0, %1 : vector<1x4x16xf32>
    %3 = arith.maximumf %0, %1 : vector<1x4x16xf32>
    %c0_4 = arith.constant 0 : index
    %c2 = arith.constant 2 : index
    %c0_5 = arith.constant 0 : index
    %4 = tpu.strided_load %arg1[%c0_4, %c2, %c0_5] {strides = array<i32: 1, 4, 1>} : memref<1x16x16xf32, #tpu.memory_space<vmem>>, vector<1x4x16xf32>
    %5 = arith.addf %2, %4 : vector<1x4x16xf32>
    %6 = arith.maximumf %3, %4 : vector<1x4x16xf32>
    %c0_6 = arith.constant 0 : index
    %c3 = arith.constant 3 : index
    %c0_7 = arith.constant 0 : index
    %7 = tpu.strided_load %arg1[%c0_6, %c3, %c0_7] {strides = array<i32: 1, 4, 1>} : memref<1x16x16xf32, #tpu.memory_space<vmem>>, vector<1x4x16xf32>
    %8 = arith.addf %5, %7 : vector<1x4x16xf32>
    %9 = arith.maximumf %6, %7 : vector<1x4x16xf32>
    %c0_8 = arith.constant 0 : index
    %c0_9 = arith.constant 0 : index
    %c0_10 = arith.constant 0 : index
    %c0_11 = arith.constant 0 : index
    %10 = vector.load %arg2[%c0_8, %c0_9, %c0_10, %c0_11] : memref<2x3x4x1xf32, #tpu.memory_space<vmem>>, vector<2x3x4x1xf32>
    %11 = tpu.iota {dimensions = array<i32: 1>} : vector<4x16xi32>
    %c0_i32 = arith.constant 0 : i32
    %12 = vector.broadcast %c0_i32 : i32 to vector<4x16xi32>
    %13 = arith.cmpi ne, %11, %12 : vector<4x16xi32>
    %c15_i32 = arith.constant 15 : i32
    %14 = vector.broadcast %c15_i32 : i32 to vector<4x16xi32>
    %15 = arith.cmpi ne, %11, %14 : vector<4x16xi32>
    %c1_i32 = arith.constant 1 : i32
    %16 = tpu.dynamic_rotate %8 by %c1_i32 dim 2 : vector<1x4x16xf32>, i32 -> vector<1x4x16xf32>
    %cst = arith.constant 0.000000e+00 : f32
    %17 = vector.shape_cast %13 : vector<4x16xi1> to vector<1x4x16xi1>
    %18 = vector.broadcast %cst : f32 to vector<1x4x16xf32>
    %19 = arith.select %17, %16, %18 : vector<1x4x16xi1>, vector<1x4x16xf32>
    %c15_i32_12 = arith.constant 15 : i32
    %20 = tpu.dynamic_rotate %8 by %c15_i32_12 dim 2 : vector<1x4x16xf32>, i32 -> vector<1x4x16xf32>
    %cst_13 = arith.constant 0.000000e+00 : f32
    %21 = vector.shape_cast %15 : vector<4x16xi1> to vector<1x4x16xi1>
    %22 = vector.broadcast %cst_13 : f32 to vector<1x4x16xf32>
    %23 = arith.select %21, %20, %22 : vector<1x4x16xi1>, vector<1x4x16xf32>
    %c1_i32_14 = arith.constant 1 : i32
    %24 = tpu.dynamic_rotate %9 by %c1_i32_14 dim 2 : vector<1x4x16xf32>, i32 -> vector<1x4x16xf32>
    %cst_15 = arith.constant 0.000000e+00 : f32
    %25 = vector.shape_cast %13 : vector<4x16xi1> to vector<1x4x16xi1>
    %26 = vector.broadcast %cst_15 : f32 to vector<1x4x16xf32>
    %27 = arith.select %25, %24, %26 : vector<1x4x16xi1>, vector<1x4x16xf32>
    %c15_i32_16 = arith.constant 15 : i32
    %28 = tpu.dynamic_rotate %9 by %c15_i32_16 dim 2 : vector<1x4x16xf32>, i32 -> vector<1x4x16xf32>
    %cst_17 = arith.constant 0.000000e+00 : f32
    %29 = vector.shape_cast %15 : vector<4x16xi1> to vector<1x4x16xi1>
    %30 = vector.broadcast %cst_17 : f32 to vector<1x4x16xf32>
    %31 = arith.select %29, %28, %30 : vector<1x4x16xi1>, vector<1x4x16xf32>
    %32 = vector.extract_strided_slice %10 {offsets = [0, 0, 0, 0], sizes = [1, 1, 4, 1], strides = [1, 1, 1, 1]} : vector<2x3x4x1xf32> to vector<1x1x4x1xf32>
    %33 = vector.shape_cast %32 : vector<1x1x4x1xf32> to vector<4x1xf32>
    %34 = vector.shape_cast %33 : vector<4x1xf32> to vector<1x4x1xf32>
    %35 = vector.broadcast %34 : vector<1x4x1xf32> to vector<1x4x16xf32>
    %36 = arith.mulf %35, %19 : vector<1x4x16xf32>
    %37 = vector.extract_strided_slice %10 {offsets = [0, 1, 0, 0], sizes = [1, 1, 4, 1], strides = [1, 1, 1, 1]} : vector<2x3x4x1xf32> to vector<1x1x4x1xf32>
    %38 = vector.shape_cast %37 : vector<1x1x4x1xf32> to vector<4x1xf32>
    %39 = vector.shape_cast %38 : vector<4x1xf32> to vector<1x4x1xf32>
    %40 = vector.broadcast %39 : vector<1x4x1xf32> to vector<1x4x16xf32>
    %41 = arith.mulf %40, %8 : vector<1x4x16xf32>
    %42 = arith.addf %36, %41 : vector<1x4x16xf32>
    %43 = vector.extract_strided_slice %10 {offsets = [0, 2, 0, 0], sizes = [1, 1, 4, 1], strides = [1, 1, 1, 1]} : vector<2x3x4x1xf32> to vector<1x1x4x1xf32>
    %44 = vector.shape_cast %43 : vector<1x1x4x1xf32> to vector<4x1xf32>
    %45 = vector.shape_cast %44 : vector<4x1xf32> to vector<1x4x1xf32>
    %46 = vector.broadcast %45 : vector<1x4x1xf32> to vector<1x4x16xf32>
    %47 = arith.mulf %46, %23 : vector<1x4x16xf32>
    %48 = arith.addf %42, %47 : vector<1x4x16xf32>
    %49 = vector.extract_strided_slice %10 {offsets = [1, 0, 0, 0], sizes = [1, 1, 4, 1], strides = [1, 1, 1, 1]} : vector<2x3x4x1xf32> to vector<1x1x4x1xf32>
    %50 = vector.shape_cast %49 : vector<1x1x4x1xf32> to vector<4x1xf32>
    %51 = vector.shape_cast %50 : vector<4x1xf32> to vector<1x4x1xf32>
    %52 = vector.broadcast %51 : vector<1x4x1xf32> to vector<1x4x16xf32>
    %53 = arith.mulf %52, %27 : vector<1x4x16xf32>
    %54 = arith.addf %48, %53 : vector<1x4x16xf32>
    %55 = vector.extract_strided_slice %10 {offsets = [1, 1, 0, 0], sizes = [1, 1, 4, 1], strides = [1, 1, 1, 1]} : vector<2x3x4x1xf32> to vector<1x1x4x1xf32>
    %56 = vector.shape_cast %55 : vector<1x1x4x1xf32> to vector<4x1xf32>
    %57 = vector.shape_cast %56 : vector<4x1xf32> to vector<1x4x1xf32>
    %58 = vector.broadcast %57 : vector<1x4x1xf32> to vector<1x4x16xf32>
    %59 = arith.mulf %58, %9 : vector<1x4x16xf32>
    %60 = arith.addf %54, %59 : vector<1x4x16xf32>
    %61 = vector.extract_strided_slice %10 {offsets = [1, 2, 0, 0], sizes = [1, 1, 4, 1], strides = [1, 1, 1, 1]} : vector<2x3x4x1xf32> to vector<1x1x4x1xf32>
    %62 = vector.shape_cast %61 : vector<1x1x4x1xf32> to vector<4x1xf32>
    %63 = vector.shape_cast %62 : vector<4x1xf32> to vector<1x4x1xf32>
    %64 = vector.broadcast %63 : vector<1x4x1xf32> to vector<1x4x16xf32>
    %65 = arith.mulf %64, %31 : vector<1x4x16xf32>
    %66 = arith.addf %60, %65 : vector<1x4x16xf32>
    %67 = arith.negf %66 : vector<1x4x16xf32>
    %68 = math.exp %67 : vector<1x4x16xf32>
    %cst_18 = arith.constant 1.000000e+00 : f32
    %69 = vector.broadcast %cst_18 : f32 to vector<1x4x16xf32>
    %70 = arith.addf %69, %68 : vector<1x4x16xf32>
    %71 = arith.divf %69, %70 : vector<1x4x16xf32>
    %72 = arith.negf %71 : vector<1x4x16xf32>
    %73 = math.exp %72 : vector<1x4x16xf32>
    %cst_19 = arith.constant 1.000000e+00 : f32
    %74 = vector.broadcast %cst_19 : f32 to vector<1x4x16xf32>
    %75 = arith.addf %74, %73 : vector<1x4x16xf32>
    %76 = arith.divf %74, %75 : vector<1x4x16xf32>
    %c0_20 = arith.constant 0 : index
    %c0_21 = arith.constant 0 : index
    %c0_22 = arith.constant 0 : index
    %77 = vector.load %arg3[%c0_20, %c0_21, %c0_22] : memref<1x4x16xf32, #tpu.memory_space<vmem>>, vector<1x4x16xf32>
    tpu.vector_store %arg3[%c0_20, %c0_21, %c0_22], %76 {strides = array<i32>} : memref<1x4x16xf32, #tpu.memory_space<vmem>>, vector<1x4x16xf32>,
    return
  }
  func.func @transform_0(%arg0: i32) -> (i32, i32, i32) {
    %c0_i32 = arith.constant 0 : i32
    %c0_i32_0 = arith.constant 0 : i32
    %c0_i32_1 = arith.constant 0 : i32
    return %arg0, %c0_i32, %c0_i32_0 : i32, i32, i32
  }
  func.func @transform_1(%arg0: i32) -> (i32, i32, i32, i32) {
    %c0_i32 = arith.constant 0 : i32
    %c0_i32_0 = arith.constant 0 : i32
    %c0_i32_1 = arith.constant 0 : i32
    %c0_i32_2 = arith.constant 0 : i32
    %c0_i32_3 = arith.constant 0 : i32
    return %c0_i32, %c0_i32_0, %c0_i32_1, %c0_i32_2 : i32, i32, i32, i32
  }
  func.func @transform_2(%arg0: i32) -> (i32, i32, i32) {
    %c0_i32 = arith.constant 0 : i32
    %c0_i32_0 = arith.constant 0 : i32
    %c0_i32_1 = arith.constant 0 : i32
    return %arg0, %c0_i32, %c0_i32_0 : i32, i32, i32
  }
}

</mosaic_0001>

<bundles_post_ra>
// kernel: tpu_custom_call.1
= control target key start
LH: loop header
LB: loop body
LE: loop exit
PB: predicated region body
PF: predicated region fallthrough
CT: control target
= control target key end

     0   :  { %7 = vsyncpa [#allocation3], 0  ;;  %s724_s0 = inlined_call_operand.hbm [shape: f32[2,16,16], index: 0, kind: input, shape index: {}]   ;;  %s725_s1 = inlined_call_operand.vmem [shape: f32[2,3,4,1], index: 1, kind: input, shape index: {}]   ;;  %s726_s2 = inlined_call_operand.hbm [shape: f32[2,4,16], index: 2, kind: output, shape index: {}]  }
   0x1   :  { %9 = vsyncpa [#allocation3 + $0x1], 0 }
   0x2   :  { %10 = vsyncpa [#allocation4], 0 }
   0x3   :  { %12 = vsyncpa [#allocation4 + $0x1], 0  ;;  %s553_s9 = smov 0   ;;  %s555_s10 = smov 0  }
   0x4   :  { %s557_s11 = smov 0   ;;  %s559_s12 = smov 0  }
   0x5 LB: > { %s574_s13 = sadd.s32 4294967295, %s528_s12   ;;  %s355_s14 = sadd.s32 4294967294, %s528_s12   ;;  %s528_s12 = sphi %s559_s12, %s741_s12   ;;  %s524_s11 = sphi %s557_s11, %s740_s11   ;;  %s520_s10 = sphi %s555_s10, %s739_s10   ;;  %s516_s9 = sphi %s553_s9, %s738_s9  }
   0x6   : > { %s578_s15 = sadd.s32 1, %s528_s12   ;;  %s25_s16 = sadd.s32 1, %s524_s11 }
   0x7   : > { %s22_s17 = ssub.s32 %s528_s12, %s578_s15  ;;  %p32_p0 = scmp.ne.s32.totalorder %s524_s11, %s520_s10 }
   0x8   : > { %p23_p1 = scmp.eq.s32.totalorder %s22_s17, 0  ;;  %p33_p2 = scmp.eq.s32.totalorder %s528_s12, 0 }
   0x9   : > { %p38_p3 = scmp.ne.s32.totalorder %s520_s10, %s516_s9  ;;  %p39_p4 = scmp.eq.s32.totalorder %s574_s13, 0 }
   0xa   : > { %s590_s18 = scalar_select %p23_p1, %s524_s11, %s25_s16  }
   0xb   : > { %p592_p5 = por %p33_p2, %p32_p0  ;;  %p596_p6 = por %p39_p4, %p38_p3 }
   0xc   : > { %p83_p7 = scmp.eq.s32.totalorder %s574_s13, 1  ;;  %p89_p8 = scmp.eq.s32.totalorder %s355_s14, 1 }
   0xd   : > { %s730_s20 = scalar_select %p596_p6, 1, 0 }
   0xe   : > { %p386_p10 = scmp.lt.s32.totalorder %s528_s12, 2  ;;  %p603_p11 = por %p83_p7, %p32_p0 }
   0xf   : > { %p607_p12 = por %p89_p8, %p38_p3  ;;  %s112_s23 = sand.u32 1, %s524_s11  }
  0x10   : > { %s731_s21 = scalar_select %p603_p11, 1, 0 }
  0x11   : > { %s732_s22 = scalar_select %p607_p12, 1, 0 }
  0x12   : > { %s373_s24 = sshll.u32 %s528_s12, 8  ;;  %s358_s25 = sshll.u32 %s112_s23, 4 }
  0x13   : > { %s616_s28 = scalar_lea.hbm %s724_s0, %s373_s24  ;;  %s116_s29 = scalar_lea.vmem [#allocation2], %s358_s25 }
  0x14   : > { %s123_s30 = sshll.u32 %s116_s29, 4  ;;  %p620_p13 = pnand %p386_p10, %p592_p5  ;;  %s624_s30 = int_to_ptr.vmem [resolvable:$true] %s123_s30 }
  0x15   : > { %s626_s4 = scalar_lea.sflag [#allocation3], %s112_s23  ;;  %s436_s5 = scalar_lea.hbm %s616_s28, 256 }
  0x16   : > { %p437_p0 = scmp.ne.s32.totalorder %s616_s28, %s436_s5  ;;  %p438_p1 = pneg %p620_p13 }
  0x17   : > { %s441_s8 = scalar_lea.hbm %s724_s0, 512  ;;  %p442_p4 = scmp.lt.s32.totalorder %s616_s28, %s724_s0 }
  0x18   : > { %p439_p2 = pnand %p438_p1, %p437_p0  ;;  %p443_p5 = scmp.lt.s32.totalorder %s441_s8, %s436_s5 }
  0x1a   : > { %p440_p3 = pneg %p439_p2  ;;  %p444_p7 = por %p443_p5, %p442_p4 }
  0x1c   : > { %p445_p8 = pnand %p444_p7, %p440_p3 }
  0x1e   : > { %448 = shalt.err (!%p445_p8)
}
  0x1f   : > { %s449_s17 = scalar_lea.vmem %s624_s30, 256  ;;  %s530_s19 = smov [#allocation2]  }
  0x20   : > { %p450_p10 = scmp.ne.s32.totalorder %s624_s30, %s449_s17  ;;  %s454_s23 = sshll.u32 %s530_s19, 4  ;;  %s455_s23 = int_to_ptr.vmem [resolvable:$false] %s454_s23 }
  0x21   : > { %s456_s24 = scalar_lea.vmem %s455_s23, 512  ;;  %p457_p2 = scmp.lt.s32.totalorder %s624_s30, %s455_s23 }
  0x22   : > { %p452_p9 = pnand %p450_p10, %p438_p1  ;;  %p458_p12 = scmp.lt.s32.totalorder %s456_s24, %s449_s17 }
  0x24   : > { %p453_p0 = pneg %p452_p9  ;;  %p459_p11 = por %p458_p12, %p457_p2 }
  0x26   : > { %p460_p6 = pnand %p459_p11, %p453_p0 }
  0x28   : > { %463 = shalt.err (!%p460_p6)
}
  0x29   : > { %s531_s25 = smov 128   ;;  %s532_s26 = smov 8  }
  0x2a   : > { %381 = dma.hbm_to_vmem [thread:$0]  (!%p620_p13), %s616_s28, 256, %s624_s30, %s626_s4, %s531_s25, %s531_s25, %s532_s26  }
  0x2b   : > { %p361_p9 = scmp.ge.s32.totalorder %s528_s12, 1  ;;  %p131_p1 = scmp.lt.s32.totalorder %s528_s12, 3 }
  0x2d   : > { %p132_p3 = pnand %p361_p9, %p131_p1 }
  0x2e   : > { %s650_s27 = sand.u32 (!%p132_p3), 1, %s520_s10   ;;  %p734_p6 = scmp.ne.s32.totalorder (!%p132_p3), %s730_s20, 0 }
  0x2f   : > { %135 = sbr.rel (%p132_p3) target bundleno = 502 (0x1f6), region = 28  ;;  %s362_s29 = sshll.u32 (!%p132_p3), %s650_s27, 4 }
  0x30   : > { %s138_s5 = scalar_lea.sflag (!%p132_p3), [#allocation3], %s650_s27  ;;  %s141_s6 = scalar_lea.vmem (!%p132_p3), [#allocation2], %s362_s29 }
  0x34   : > { %507 = dma.done.wait (%p734_p6), %s138_s5, 256  }
  0x35   : > { %509 = vsyncadd (%p734_p6), %s138_s5, 4294967040  ;;  %v162_v0 = vld [vmem:[%s141_s6] ss:$4 sm:$0xf]  ;;  %v533_v2 = vmov 0   ;;  %s534_s28 = smov 16   ;;  %v181_v26 = vlaneseq }
  0x36   : > { %v364_v1 = vld [vmem:[%s141_s6 + $0x1] ss:$4 sm:$0xf]  ;;  %427 = vset.pattern.permute.xlu1 %v533_v2  ;;  %426 = vset.pattern.permute.xlu0 %v533_v2  ;;  %v365_v4 = vld [vmem:[%s141_s6 + $0x2] ss:$4 sm:$0xf] }
  0x37   : > { %v165_v3 = vadd.f32 %v364_v1, %v162_v0  ;;  %v166_v5 = vmax.f32 %v162_v0, %v364_v1  ;;  %v366_v6 = vld [vmem:[%s141_s6 + $0x3] ss:$4 sm:$0xf]  ;;  %vm185_vm0 = vcmask 1047680   ;;  %s535_s25 = smov 113   ;;  %s536_s26 = smov 127  }
  0x38   : > { %v175_v11 = vld [vmem:[%s725_s1] sm:$0xf]  ;;  %v176_v16 = vld [vmem:[%s725_s1 + $0x4] sm:$0xf]  ;;  %v177_v17 = vld [vmem:[%s725_s1 + $0x8] sm:$0xf] }
  0x39   : > { %v169_v7 = vadd.f32 %v365_v4, %v165_v3  ;;  %v170_v8 = vmax.f32 %v166_v5, %v365_v4  ;;  %v178_v18 = vld [vmem:[%s725_s1 + $0xc] sm:$0xf]  ;;  %v179_v19 = vld [vmem:[%s725_s1 + $0x10] sm:$0xf]  ;;  %v180_v20 = vld [vmem:[%s725_s1 + $0x14] sm:$0xf] }
  0x3a   : > { %v182_v28 = vand.u32 127, %v181_v26  ;;  %s363_s29 = sshll.u32 %s650_s27, 2  ;;  %s370_s5 = sshll.u32 %s574_s13, 6  ;;  %vm269_vm3 = vcmask 125952  }
  0x3b   : > { %v173_v9 = vadd.f32 %v366_v6, %v169_v7  ;;  %v174_v10 = vmax.f32 %v170_v8, %v366_v6  ;;  %s161_s6 = scalar_lea.vmem [#allocation5], %s363_s29  ;;  %s687_s20 = scalar_lea.hbm %s726_s2, %s370_s5 }
  0x3c   : > { %vm183_vm1 = vcmp.ne.s32.totalorder %v182_v28, 0  ;;  %vm184_vm2 = vcmp.ne.s32.totalorder %v182_v28, 15  ;;  %s272_s4 = scalar_lea.sflag [#allocation4], %s650_s27  ;;  %p735_p12 = scmp.ne.s32.totalorder %s731_s21, 0 }
  0x3d   : > { %186 = vrot.lane.b32.xlu0 %v173_v9, %s534_s28  ;;  %s537_s8 = smov [#allocation5]  }
  0x3e   : > { %s468_s14 = sshll.u32 %s537_s8, 4  ;;  %s469_s14 = int_to_ptr.vmem [resolvable:$false] %s468_s14 }
  0x3f   : > { %s470_s13 = scalar_lea.vmem %s469_s14, 128 }
  0x41   : > { %201 = vrot.lane.b32.xlu0 %v174_v10, %s534_s28 }
  0x45   : > { %218 = vperm.xlu0 %426, %v175_v11  }
  0xaf   : > { %v187_v12 = vpop.permute.xlu0 %186 }
  0xb0   : > { %v188_v13 = vsel %vm185_vm0, %v187_v12, %v173_v9 }
  0xb1   : > { %189 = vrot.lane.b32.xlu1 %v188_v13, %s534_s28 }
  0xb3   : > { %v202_v14 = vpop.permute.xlu0 %201 }
  0xb4   : > { %v203_v15 = vsel %vm185_vm0, %v202_v14, %v174_v10 }
  0xb5   : > { %204 = vrot.lane.b32.xlu1 %v203_v15, %s534_s28  ;;  %s285_s28 = sshll.u32 %s161_s6, 4  ;;  %s286_s28 = int_to_ptr.vmem [resolvable:$true] %s285_s28 }
  0xb6   : > { %s464_s7 = scalar_lea.vmem %s286_s28, 64  ;;  %p471_p5 = scmp.lt.s32.totalorder %s286_s28, %s469_s14 }
  0xb7   : > { %p465_p11 = scmp.ne.s32.totalorder %s286_s28, %s464_s7  ;;  %p472_p7 = scmp.lt.s32.totalorder %s470_s13, %s464_s7 }
  0xb9   : > { %224 = vperm.xlu1 %427, %v176_v16   ;;  %p466_p13 = pnand %p465_p11, %p735_p12  ;;  %p473_p8 = por %p472_p7, %p471_p5 }
  0xbb   : > { %p467_p4 = pneg %p466_p13 }
  0xbd   : > { %231 = vperm.xlu1 %427, %v177_v17   ;;  %p474_p10 = pnand %p473_p8, %p467_p4 }
  0xc0   : > { %v219_v27 = vpop.permute.xlu0 %218 }
  0xc1   : > { %238 = vperm.xlu1 %427, %v178_v18  }
  0xc5   : > { %245 = vperm.xlu1 %427, %v179_v19  }
  0xc9   : > { %252 = vperm.xlu1 %427, %v180_v20  }
 0x123   : > { %v190_v21 = vpop.permute.xlu1 %189 }
 0x124   : > { %v191_v22 = vsel %vm185_vm0, %v190_v21, %v173_v9 }
 0x125   : > { %193 = vrot.lane.b32.xlu0 %v191_v22, %s535_s25 }
 0x127   : > { %v205_v23 = vpop.permute.xlu1 %204 }
 0x128   : > { %v206_v24 = vsel %vm185_vm0, %v205_v23, %v174_v10 }
 0x129   : > { %197 = vrot.lane.b32.xlu0 %v191_v22, %s536_s26 }
 0x12d   : > { %208 = vrot.lane.b32.xlu0 %v206_v24, %s535_s25 }
 0x131   : > { %212 = vrot.lane.b32.xlu0 %v206_v24, %s536_s26 }
 0x134   : > { %v225_v25 = vpop.permute.xlu1 %224 }
 0x135   : > { %v227_v36 = vmul.f32 %v225_v25, %v173_v9 }
 0x138   : > { %v232_v29 = vpop.permute.xlu1 %231 }
 0x13c   : > { %v239_v31 = vpop.permute.xlu1 %238 }
 0x140   : > { %v246_v38 = vpop.permute.xlu1 %245 }
 0x141   : > { %v248_v44 = vmul.f32 %v246_v38, %v174_v10 }
 0x144   : > { %v253_v47 = vpop.permute.xlu1 %252 }
 0x197   : > { %v194_v30 = vpop.permute.xlu0 %193 }
 0x198   : > { %v196_v32 = vsel %vm183_vm1, %v194_v30, 0.0 }
 0x199   : > { %v221_v33 = vmul.f32 %v219_v27, %v196_v32 }
 0x19b   : > { %v198_v34 = vpop.permute.xlu0 %197  ;;  %v228_v39 = vadd.f32 %v227_v36, %v221_v33 }
 0x19c   : > { %v200_v35 = vsel %vm184_vm2, %v198_v34, 0.0 }
 0x19d   : > { %v234_v37 = vmul.f32 %v232_v29, %v200_v35 }
 0x19f   : > { %v209_v40 = vpop.permute.xlu0 %208  ;;  %v235_v42 = vadd.f32 %v234_v37, %v228_v39 }
 0x1a0   : > { %v211_v41 = vsel %vm183_vm1, %v209_v40, 0.0 }
 0x1a1   : > { %v241_v43 = vmul.f32 %v239_v31, %v211_v41 }
 0x1a3   : > { %v242_v45 = vadd.f32 %v241_v43, %v235_v42  ;;  %v213_v46 = vpop.permute.xlu0 %212 }
 0x1a4   : > { %v215_v48 = vsel %vm184_vm2, %v213_v46, 0.0 }
 0x1a5   : > { %v249_v49 = vadd.f32 %v248_v44, %v242_v45  ;;  %v255_v50 = vmul.f32 %v253_v47, %v215_v48 }
 0x1a7   : > { %v256_v51 = vadd.f32 %v255_v50, %v249_v49 }
 0x1a9   : > { %v367_v52 = vmul.f32 -1.442695, %v256_v51 }
 0x1ab   : > { %428 = vpow2.f32 %v367_v52 }
 0x1b8   : > { %v429_v53 = vpop.eup %428 }
 0x1b9   : > { %v260_v54 = vadd.f32 1.0, %v429_v53 }
 0x1bb   : > { %430 = vrcp.f32 %v260_v54 }
 0x1c8   : > { %v431_v55 = vpop.eup %430 }
 0x1c9   : > { %v368_v56 = vmul.f32 -1.442695, %v431_v55 }
 0x1cb   : > { %432 = vpow2.f32 %v368_v56 }
 0x1d8   : > { %v433_v57 = vpop.eup %432 }
 0x1d9   : > { %v266_v58 = vadd.f32 1.0, %v433_v57 }
 0x1db   : > { %434 = vrcp.f32 %v266_v58 }
 0x1e8   : > { %v435_v59 = vpop.eup %434 }
 0x1e9   : > { %270 = vst.msk [vmem:[%s161_s6] sm:$0xf] %vm269_vm3, %v435_v59 }
 0x1ea   : > { %477 = shalt.err (!%p474_p10)
}
 0x1eb   : > { %s478_s16 = scalar_lea.hbm %s687_s20, 64  ;;  %s482_s19 = scalar_lea.hbm %s726_s2, 128 }
 0x1ec   : > { %p479_p0 = scmp.ne.s32.totalorder %s687_s20, %s478_s16  ;;  %p483_p1 = scmp.lt.s32.totalorder %s687_s20, %s726_s2 }
 0x1ed   : > { %p484_p3 = scmp.lt.s32.totalorder %s482_s19, %s478_s16 }
 0x1ee   : > { %p480_p2 = pnand %p479_p0, %p735_p12 }
 0x1ef   : > { %p485_p6 = por %p484_p3, %p483_p1 }
 0x1f0   : > { %p481_p9 = pneg %p480_p2 }
 0x1f2   : > { %p486_p11 = pnand %p485_p6, %p481_p9 }
 0x1f4   : > { %489 = shalt.err (!%p486_p11)
}
 0x1f5   : > { %376 = dma.vmem_to_hbm [thread:$0]  (%p735_p12), %s286_s28, 64, %s687_s20, %s272_s4  }
 0x1f6 PF: > { %s297_s25 = sand.u32 1, %s516_s9   ;;  %p736_p13 = scmp.ne.s32.totalorder %s732_s22, 0 }
 0x1f7   : > { %p737_p4 = scmp.ge.s32.totalorder %s528_s12, 2  ;;  %s298_s26 = scalar_lea.sflag [#allocation4], %s297_s25 }
 0x1f9   : > { %p383_p5 = pnand %p737_p4, %p736_p13 }
 0x1fb   : > { %p384_p7 = pneg %p383_p5 }
 0x1fd   : > { %511 = dma.done.wait (%p384_p7), %s298_s26, 64  }
 0x1fe   : > { %513 = vsyncadd (%p384_p7), %s298_s26, 4294967232  ;;  %p15_p8 = scmp.ge.s32.totalorder %s578_s15, 4   ;;  %s738_s9 = smov %s520_s10 }
 0x1ff   : > { %s739_s10 = smov %s524_s11  ;;  %s740_s11 = smov %s590_s18 }
 0x200   : > { %s741_s12 = smov %s578_s15  ;;  %17 = sbr.rel (!%p15_p8) target bundleno = 5 (0x5), region = 76 }
 0x205   :  { %303 = vsyncpa [#allocation3], 1 }
 0x206   :  { %305 = vsyncpa [#allocation3 + $0x1], 1 }
 0x207   :  { %306 = vsyncpa [#allocation4], 1 }
 0x208   :  { %308 = vsyncpa [#allocation4 + $0x1], 1 }

</bundles_post_ra>
